<compile_context>
chip_gen: v7x
topology: tpu7x:2x2x1
jax: 0.10.0
libtpu: 0.0.40
codegen_flags: <defaults>
</compile_context>

<pallas_src>
import functools

import jax
import jax.numpy as jnp
from jax.experimental import pallas as pl
from jax.experimental.pallas import tpu as pltpu


def _round_up(x, m):
    return ((x + m - 1) // m) * m


def _tpu_vmem_bytes():
    try:
        return int(pltpu.get_tpu_info().vmem_capacity_bytes)
    except Exception:  # pragma: no cover - conservative (v7x-sized) fallback
        return 64 << 20


# ---------------------------------------------------------------------------
# Fused backbone + policy head (online softmax) + value head kernel
# ---------------------------------------------------------------------------

def _actor_critic_kernel(resp_ref, x_ref, w1_ref, b1_ref, wlm_ref, wv_ref, *rest,
                         inv_temp, tile_v, v_actual, mask_vocab, return_logits):
    if return_logits:
        lp_ref, ent_ref, val_ref, logits_ref = rest[:4]
        hb_sc, m_sc, d_sc, s_sc, g_sc = rest[4:]
    else:
        lp_ref, ent_ref, val_ref = rest[:3]
        logits_ref = None
        hb_sc, m_sc, d_sc, s_sc, g_sc = rest[3:]

    j = pl.program_id(1)
    nv = pl.num_programs(1)
    tn = hb_sc.shape[0]

    # ---- backbone + value head: once per row tile (vocab axis is innermost)
    @pl.when(j == 0)
    def _():
        h = jnp.tanh(
            jnp.dot(x_ref[...], w1_ref[...], preferred_element_type=jnp.float32)
            + b1_ref[...])
        # fused value head on the fresh f32 hidden (VPU reduction, not a matmul)
        val_ref[...] = jnp.sum(h * wv_ref[...], axis=-1, keepdims=True)
        # cache the temperature-scaled bf16 hidden once (reused every vocab step)
        hb_sc[...] = (h * inv_temp).astype(hb_sc.dtype)
        m_sc[...] = jnp.full_like(m_sc, -1e30)      # running max
        d_sc[...] = jnp.zeros_like(d_sc)            # running sum exp(l - m)
        s_sc[...] = jnp.zeros_like(s_sc)            # running sum exp(l - m) * l
        g_sc[...] = jnp.zeros_like(g_sc)            # selected (response) logit

    # ---- lm head on this vocab block (MXU, f32 accumulation)
    l_blk = jnp.dot(hb_sc[...], wlm_ref[...], preferred_element_type=jnp.float32)
    if return_logits:
        logits_ref[...] = l_blk.astype(logits_ref.dtype)

    col = jax.lax.broadcasted_iota(jnp.int32, (tn, tile_v), 1) + j * tile_v

    def _online_update(lb):
        # online softmax statistics (no [tn, tile_v] p / logp temporaries)
        m_old = m_sc[...]
        m_new = jnp.maximum(m_old, jnp.max(lb, axis=-1, keepdims=True))
        alpha = jnp.exp(m_old - m_new)
        e_blk = jnp.exp(lb - m_new)                 # masked cols -> exactly 0
        d_sc[...] = d_sc[...] * alpha + jnp.sum(e_blk, axis=-1, keepdims=True)
        s_sc[...] = s_sc[...] * alpha + jnp.sum(e_blk * lb, axis=-1, keepdims=True)
        m_sc[...] = m_new
        sel = col == resp_ref[...]                  # one-hot of response token
        g_sc[...] = g_sc[...] + jnp.sum(jnp.where(sel, lb, 0.0),
                                        axis=-1, keepdims=True)

    if mask_vocab:
        # padded vocab columns exist only in the LAST vocab tile; keep the
        # compare+select off the per-step epilogue of all other tiles.
        @pl.when(j < nv - 1)
        def _():
            _online_update(l_blk)

        @pl.when(j == nv - 1)
        def _():
            # -1e30 (finite) so exp underflows to 0 and 0 * (-1e30) stays finite
            _online_update(jnp.where(col < v_actual, l_blk, -1e30))
    else:
        _online_update(l_blk)

    # ---- finalize on the last vocab step
    @pl.when(j == nv - 1)
    def _():
        d = d_sc[...]
        log_z = m_sc[...] + jnp.log(d)
        lp_ref[...] = g_sc[...] - log_z
        ent_ref[...] = log_z - s_sc[...] * pl.reciprocal(d, approx=True)


# ---------------------------------------------------------------------------
# Wrapper around pallas_call
# ---------------------------------------------------------------------------

def fused_policy_value(x_flat, resp_flat, w1, b1, w_lm, w_value, *,
                       temperature, return_logits=False, tile_v=None,
                       row_tile=None, matmul_dtype=jnp.bfloat16,
                       logits_dtype=jnp.bfloat16):
    n, h = x_flat.shape
    v = w_lm.shape[1]
    itm = jnp.dtype(matmul_dtype).itemsize
    litm = jnp.dtype(logits_dtype).itemsize

    # ---- generation-aware tile / VMEM budget selection
    phys = _tpu_vmem_bytes()                               # 128 MiB v5e/v6e, 64 MiB v7x
    vmem_cap = max(16 << 20, min(int(phys * 3 // 4), 96 << 20))

    if tile_v is None:
        tile_v = min(2048 if phys >= (100 << 20) else 1024, _round_up(v, 128))
    tile_v = _round_up(tile_v, 128)

    if row_tile is None:
        row_target = 512                                   # rows per w_lm pass
        n8 = _round_up(max(n, 1), 8)
        row_tile = n8 if n8 <= row_target else row_target  # 1 pass over w_lm if N small
    row_tile = _round_up(max(row_tile, 8), 8)

    def _need(rows, tv):
        resident = h * h * itm + 2 * h * 4                 # w1 + b1 + wv (single buffer)
        streamed = 2 * (rows * h * itm + rows * 4 + h * tv * itm)   # double-buffered
        outs = 2 * 3 * rows * 4
        if return_logits:
            outs += 2 * rows * tv * litm
        scratch = rows * h * itm + 4 * rows * 4            # bf16 hidden + 4 stat columns
        return resident + streamed + outs + scratch + (4 << 20)

    while _need(row_tile, tile_v) > vmem_cap:
        if tile_v > 128:
            tile_v = _round_up(tile_v // 2, 128)
        elif row_tile > 8:
            row_tile = _round_up(max(row_tile // 2, 8), 8)
        else:
            break

    n_pad = _round_up(max(n, 1), row_tile)
    v_pad = _round_up(v, tile_v)
    r_tiles = n_pad // row_tile
    nv = v_pad // tile_v
    mask_vocab = (v_pad != v)

    # ---- pad rows / vocab to tile multiples; bf16 operands for the MXU streams
    xp = jnp.zeros((n_pad, h), matmul_dtype).at[:n].set(x_flat.astype(matmul_dtype))
    rp = jnp.zeros((n_pad, 1), jnp.int32).at[:n].set(
        resp_flat.reshape(-1, 1).astype(jnp.int32))
    # TODO(synk): optionally quantize w_lm (int8 on v5e/v6e, fp8 on v7x) with
    # per-column scales folded into the epilogue to halve the HBM-bound stream.
    wlmp = jnp.zeros((h, v_pad), matmul_dtype).at[:, :v].set(w_lm.astype(matmul_dtype))
    w1c = w1.astype(matmul_dtype)
    b1r = b1.reshape(1, h).astype(jnp.float32)
    wvr = w_value.reshape(1, h).astype(jnp.float32)

    # w1/b1/wv: whole-array VMEM residents, single-buffered (constant index map,
    # a second pipeline buffer would be pure waste -- mandatory on v7x for big H).
    # TODO(synk): for very large hidden sizes w1 should be K-tiled instead.
    resident = pl.BlockSpec(memory_space=pltpu.MemorySpace.VMEM)
    in_specs = [
        pl.BlockSpec((row_tile, 1), lambda i, j: (i, 0)),     # response ids
        pl.BlockSpec((row_tile, h), lambda i, j: (i, 0)),     # embedded inputs
        resident,                                             # w1
        resident,                                             # b1
        pl.BlockSpec((h, tile_v), lambda i, j: (0, j)),       # w_lm vocab block
        resident,                                             # value-head weights
    ]
    out_shapes = [jax.ShapeDtypeStruct((n_pad, 1), jnp.float32) for _ in range(3)]
    out_specs = [pl.BlockSpec((row_tile, 1), lambda i, j: (i, 0)) for _ in range(3)]
    if return_logits:
        out_shapes.append(jax.ShapeDtypeStruct((n_pad, v_pad), logits_dtype))
        out_specs.append(pl.BlockSpec((row_tile, tile_v), lambda i, j: (i, j)))

    scratch = [
        pltpu.VMEM((row_tile, h), matmul_dtype),   # temperature-scaled bf16 hidden
        pltpu.VMEM((row_tile, 1), jnp.float32),    # running max
        pltpu.VMEM((row_tile, 1), jnp.float32),    # running denom
        pltpu.VMEM((row_tile, 1), jnp.float32),    # running sum(exp * logit)
        pltpu.VMEM((row_tile, 1), jnp.float32),    # selected logit
    ]

    vmem_limit = int(min(max(32 << 20, _need(row_tile, tile_v)), phys * 9 // 10))

    kernel = functools.partial(
        _actor_critic_kernel,
        inv_temp=float(1.0 / temperature),   # TODO(synk): runtime temperature could
        tile_v=tile_v,                       # use a scalar-prefetch SMEM operand.
        v_actual=v,
        mask_vocab=mask_vocab,
        return_logits=return_logits)

    outs = pl.pallas_call(
        kernel,
        out_shape=tuple(out_shapes),
        grid_spec=pltpu.PrefetchScalarGridSpec(
            num_scalar_prefetch=0,
            grid=(r_tiles, nv),
            in_specs=in_specs,
            out_specs=tuple(out_specs),
            scratch_shapes=scratch),
        compiler_params=pltpu.CompilerParams(
            dimension_semantics=("parallel", "arbitrary"),
            vmem_limit_bytes=vmem_limit),
    )(rp, xp, w1c, b1r, wlmp, wvr)

    logprobs = outs[0][:n, 0]
    entropies = outs[1][:n, 0]
    values = outs[2][:n, 0]
    logits = outs[3][:n, :v] if return_logits else None
    return logprobs, entropies, values, logits


# ---------------------------------------------------------------------------
# ActorCritic forward
# ---------------------------------------------------------------------------

def actor_critic_forward(params, queries, query_attn_masks, responses,
                         images=None, temperature=None, mode=None,
                         return_logits=False, tile_v=None):
    # TODO(synk): query_attn_masks / images are accepted for API parity but the
    # synthetic per-token base model has no attention, so they are unused.
    del query_attn_masks, images
    if temperature is None:
        temperature = 1.0
    if mode not in (None, "policy", "value"):
        raise ValueError(f"Unknown mode: {mode}")

    b, _ = queries.shape
    _, tr = responses.shape
    h = params["emb"].shape[1]
    v = params["w_lm"].shape[1]

    # Only the positions that predict the response tokens feed the heads; the
    # per-token (attention-free) synthetic backbone lets us skip all other
    # query positions (NOT valid for a real transformer backbone).
    pred_ids = jnp.concatenate([queries[:, -1:], responses[:, :-1]], axis=1)  # [B,Tr]
    x_flat = jnp.take(params["emb"], pred_ids, axis=0).reshape(-1, h)         # [B*Tr,H]
    resp_flat = responses.reshape(-1, 1).astype(jnp.int32)

    lp, ent, val, logits = fused_policy_value(
        x_flat, resp_flat, params["w1"], params["b1"], params["w_lm"],
        params["w_value"], temperature=temperature, return_logits=return_logits,
        tile_v=tile_v)
    val = val + params["b_value"][0, 0]

    out = {}
    if mode in (None, "policy"):
        out["logprobs"] = lp.reshape(b, tr)
        out["entropies"] = ent.reshape(b, tr)
        if return_logits:
            # NOTE: logits are temperature-scaled (logits / temperature),
            # consistent with the logprobs/entropies above, stored in bf16.
            out["logits"] = logits.reshape(b, tr, v)
    if mode in (None, "value"):
        out["values"] = val.reshape(b, tr)
    if mode == "policy":
        out["dummy_loss"] = 0.0 * (jnp.mean(params["w_value"]) + jnp.mean(params["b_value"]))
    if mode == "value":
        out["dummy_loss"] = 0.0 * jnp.mean(params["w_lm"])
    return out


# ---------------------------------------------------------------------------
# Deterministic parameter init (value head zero-initialized, as in the module)
# ---------------------------------------------------------------------------

def init_params(key, vocab, hidden):
    k1, k2, k3 = jax.random.split(key, 3)
    return {
        "emb": jax.random.normal(k1, (vocab, hidden), jnp.float32) * 0.02,
        "w1": jax.random.normal(k2, (hidden, hidden), jnp.float32) * 0.05,
        "b1": jnp.zeros((1, hidden), jnp.float32),
        "w_lm": jax.random.normal(k3, (hidden, vocab), jnp.float32) * 0.05,
        # Value.__init__: value_head weight/bias explicitly zeroed.
        "w_value": jnp.zeros((hidden, 1), jnp.float32),
        "b_value": jnp.zeros((1, 1), jnp.float32),
    }


# ---------------------------------------------------------------------------
# Pure-JAX reference (f32) for correctness checking
# ---------------------------------------------------------------------------

def reference_forward(params, queries, responses, temperature):
    pred_ids = jnp.concatenate([queries[:, -1:], responses[:, :-1]], axis=1)
    x = jnp.take(params["emb"], pred_ids, axis=0)
    h = jnp.tanh(x @ params["w1"] + params["b1"][0])
    logits = (h @ params["w_lm"]) / temperature
    logp = jax.nn.log_softmax(logits, axis=-1)
    p = jax.nn.softmax(logits, axis=-1)
    lp_sel = jnp.take_along_axis(logp, responses[..., None], axis=-1)[..., 0]
    ent = -jnp.sum(p * logp, axis=-1)
    vals = (h @ params["w_value"])[..., 0] + params["b_value"][0, 0]
    return logits, lp_sel, ent, vals


if __name__ == "__main__":
    # --- test 1: small shapes, vocab fits a single tile ---------------------
    B, TQ, TR, H, V = 2, 8, 8, 32, 128
    key = jax.random.PRNGKey(0)
    kp, kq, kr = jax.random.split(key, 3)

    params = init_params(kp, V, H)
    queries = jax.random.randint(kq, (B, TQ), 0, V, dtype=jnp.int32)
    responses = jax.random.randint(kr, (B, TR), 0, V, dtype=jnp.int32)
    query_attn_masks = jnp.ones((B, TQ), jnp.int32)

    ref_logits, ref_lp, ref_ent, ref_val = reference_forward(
        params, queries, responses, 0.7)

    # default (optimized) path: no [N, V] logits writeback
    out = actor_critic_forward(params, queries, query_attn_masks, responses,
                               temperature=0.7, mode=None, return_logits=False)
    jax.block_until_ready(out)
    assert out["logprobs"].shape == (B, TR)
    assert out["entropies"].shape == (B, TR)
    assert out["values"].shape == (B, TR)
    assert bool(jnp.all(out["values"] == 0.0))          # zero-init value head
    assert bool(jnp.allclose(out["logprobs"], ref_lp, atol=2e-2, rtol=2e-2))
    assert bool(jnp.allclose(out["entropies"], ref_ent, atol=2e-2, rtol=2e-2))
    # NOTE: exact match only holds because the value head is zero-initialized.
    assert bool(jnp.allclose(out["values"], ref_val, atol=1e-6, rtol=0.0))

    # opt-in logits path (bf16 writeback)
    out2 = actor_critic_forward(params, queries, query_attn_masks, responses,
                                temperature=0.7, mode=None, return_logits=True)
    jax.block_until_ready(out2)
    assert out2["logits"].shape == (B, TR, V)
    assert bool(jnp.allclose(out2["logits"].astype(jnp.float32), ref_logits,
                             atol=2e-2, rtol=2e-2))
    assert bool(jnp.allclose(out2["logprobs"], ref_lp, atol=2e-2, rtol=2e-2))

    # mode-specific paths (dummy losses as in the original module)
    outp = actor_critic_forward(params, queries, query_attn_masks, responses,
                                temperature=0.7, mode="policy")
    outv = actor_critic_forward(params, queries, query_attn_masks, responses,
                                mode="value")
    jax.block_until_ready((outp, outv))
    assert "values" not in outp and "dummy_loss" in outp
    assert "logprobs" not in outv and "dummy_loss" in outv

    # --- test 2: ragged vocab (padding mask on last tile), multi vocab tiles,
    #             and padded rows ------------------------------------------
    B2, TQ2, TR2, H2, V2 = 2, 5, 7, 32, 160
    kp2, kq2, kr2 = jax.random.split(jax.random.PRNGKey(1), 3)
    params2 = init_params(kp2, V2, H2)
    queries2 = jax.random.randint(kq2, (B2, TQ2), 0, V2, dtype=jnp.int32)
    responses2 = jax.random.randint(kr2, (B2, TR2), 0, V2, dtype=jnp.int32)
    masks2 = jnp.ones((B2, TQ2), jnp.int32)

    _, ref_lp2, ref_ent2, ref_val2 = reference_forward(
        params2, queries2, responses2, 1.3)
    out3 = actor_critic_forward(params2, queries2, masks2, responses2,
                                temperature=1.3, mode=None, return_logits=False,
                                tile_v=128)   # forces 2 vocab tiles + mask path
    jax.block_until_ready(out3)
    assert bool(jnp.allclose(out3["logprobs"], ref_lp2, atol=2e-2, rtol=2e-2))
    assert bool(jnp.allclose(out3["entropies"], ref_ent2, atol=2e-2, rtol=2e-2))
    assert bool(jnp.allclose(out3["values"], ref_val2, atol=1e-6, rtol=0.0))

    print("KERNEL_OK")
</pallas_src>

<mosaic_0001>
module attributes {stable_mosaic.version = 11 : i64} {
  func.func @_actor_critic_kernel(%arg0: i32, %arg1: i32, %arg2: memref<16x1xi32, #tpu.memory_space<vmem>>, %arg3: memref<16x32xbf16, #tpu.memory_space<vmem>>, %arg4: memref<32x32xbf16, #tpu.memory_space<vmem>>, %arg5: memref<1x32xf32, #tpu.memory_space<vmem>>, %arg6: memref<32x128xbf16, #tpu.memory_space<vmem>>, %arg7: memref<1x32xf32, #tpu.memory_space<vmem>>, %arg8: memref<16x1xf32, #tpu.memory_space<vmem>>, %arg9: memref<16x1xf32, #tpu.memory_space<vmem>>, %arg10: memref<16x1xf32, #tpu.memory_space<vmem>>, %arg11: memref<16x32xbf16, #tpu.memory_space<vmem>>, %arg12: memref<16x1xf32, #tpu.memory_space<vmem>>, %arg13: memref<16x1xf32, #tpu.memory_space<vmem>>, %arg14: memref<16x1xf32, #tpu.memory_space<vmem>>, %arg15: memref<16x1xf32, #tpu.memory_space<vmem>>) attributes {dimension_semantics = [#tpu.dimension_semantics<parallel>, #tpu.dimension_semantics<arbitrary>], iteration_bounds = array<i64: 1, 1>, scalar_prefetch = 0 : i64, scratch_operands = 5 : i64, tpu.core_type = #tpu.core_type<tc>, window_params = [{transform_indices = @transform_0, window_bounds = array<i64: 16, 1>}, {transform_indices = @transform_1, window_bounds = array<i64: 16, 32>}, {pipeline_mode = #tpu.pipeline_mode<synchronous>, transform_indices = @transform_2, window_bounds = array<i64: 32, 32>}, {pipeline_mode = #tpu.pipeline_mode<synchronous>, transform_indices = @transform_3, window_bounds = array<i64: 1, 32>}, {transform_indices = @transform_4, window_bounds = array<i64: 32, 128>}, {pipeline_mode = #tpu.pipeline_mode<synchronous>, transform_indices = @transform_5, window_bounds = array<i64: 1, 32>}, {transform_indices = @transform_6, window_bounds = array<i64: 16, 1>}, {transform_indices = @transform_7, window_bounds = array<i64: 16, 1>}, {transform_indices = @transform_8, window_bounds = array<i64: 16, 1>}]} {
    %c0_i32 = arith.constant 0 : i32
    %0 = arith.cmpi eq, %arg1, %c0_i32 : i32
    %1 = arith.extui %0 : i1 to i32
    %c0_i32_0 = arith.constant 0 : i32
    %2 = arith.cmpi ne, %1, %c0_i32_0 : i32
    scf.if %2 {
      %c0_29 = arith.constant 0 : index
      %c0_30 = arith.constant 0 : index
      %46 = vector.load %arg3[%c0_29, %c0_30] : memref<16x32xbf16, #tpu.memory_space<vmem>>, vector<16x32xbf16>
      %c0_31 = arith.constant 0 : index
      %c0_32 = arith.constant 0 : index
      %47 = vector.load %arg4[%c0_31, %c0_32] : memref<32x32xbf16, #tpu.memory_space<vmem>>, vector<32x32xbf16>
      %cst_33 = arith.constant dense<0.000000e+00> : vector<16x32xf32>
      %48 = tpu.matmul %46, %47, %cst_33 {dimension_numbers = #tpu.dot_dimension_numbers<[1], [0], [0], [1], [0, 0, 1, 1], [], []>} : vector<16x32xbf16>, vector<32x32xbf16>, vector<16x32xf32> -> vector<16x32xf32>
      %c0_34 = arith.constant 0 : index
      %c0_35 = arith.constant 0 : index
      %49 = vector.load %arg5[%c0_34, %c0_35] : memref<1x32xf32, #tpu.memory_space<vmem>>, vector<1x32xf32>
      %50 = vector.broadcast %49 : vector<1x32xf32> to vector<16x32xf32>
      %51 = arith.addf %48, %50 : vector<16x32xf32>
      %52 = math.tanh %51 : vector<16x32xf32>
      %c0_36 = arith.constant 0 : index
      %c0_37 = arith.constant 0 : index
      %53 = vector.load %arg7[%c0_36, %c0_37] : memref<1x32xf32, #tpu.memory_space<vmem>>, vector<1x32xf32>
      %54 = vector.broadcast %53 : vector<1x32xf32> to vector<16x32xf32>
      %55 = arith.mulf %52, %54 : vector<16x32xf32>
      %cst_38 = arith.constant dense<0.000000e+00> : vector<16xf32>
      %56 = vector.multi_reduction <add>, %55, %cst_38 [1] : vector<16x32xf32> to vector<16xf32>
      %57 = vector.shape_cast %56 : vector<16xf32> to vector<16x1xf32>
      %c0_39 = arith.constant 0 : index
      %c0_40 = arith.constant 0 : index
      %58 = vector.load %arg10[%c0_39, %c0_40] : memref<16x1xf32, #tpu.memory_space<vmem>>, vector<16x1xf32>
      tpu.vector_store %arg10[%c0_39, %c0_40], %57 {strides = array<i32>} : memref<16x1xf32, #tpu.memory_space<vmem>>, vector<16x1xf32>,
      %cst_41 = arith.constant 1.42857146 : f32
      %59 = vector.broadcast %cst_41 : f32 to vector<16x32xf32>
      %60 = arith.mulf %52, %59 : vector<16x32xf32>
      %61 = arith.truncf %60 : vector<16x32xf32> to vector<16x32xbf16>
      %c0_42 = arith.constant 0 : index
      %c0_43 = arith.constant 0 : index
      %62 = vector.load %arg11[%c0_42, %c0_43] : memref<16x32xbf16, #tpu.memory_space<vmem>>, vector<16x32xbf16>
      tpu.vector_store %arg11[%c0_42, %c0_43], %61 {strides = array<i32>} : memref<16x32xbf16, #tpu.memory_space<vmem>>, vector<16x32xbf16>,
      %cst_44 = arith.constant -1.000000e+30 : f32
      %63 = vector.broadcast %cst_44 : f32 to vector<16x1xf32>
      %c0_45 = arith.constant 0 : index
      %c0_46 = arith.constant 0 : index
      %64 = vector.load %arg12[%c0_45, %c0_46] : memref<16x1xf32, #tpu.memory_space<vmem>>, vector<16x1xf32>
      tpu.vector_store %arg12[%c0_45, %c0_46], %63 {strides = array<i32>} : memref<16x1xf32, #tpu.memory_space<vmem>>, vector<16x1xf32>,
      %cst_47 = arith.constant 0.000000e+00 : f32
      %65 = vector.broadcast %cst_47 : f32 to vector<16x1xf32>
      %c0_48 = arith.constant 0 : index
      %c0_49 = arith.constant 0 : index
      %66 = vector.load %arg13[%c0_48, %c0_49] : memref<16x1xf32, #tpu.memory_space<vmem>>, vector<16x1xf32>
      tpu.vector_store %arg13[%c0_48, %c0_49], %65 {strides = array<i32>} : memref<16x1xf32, #tpu.memory_space<vmem>>, vector<16x1xf32>,
      %cst_50 = arith.constant 0.000000e+00 : f32
      %67 = vector.broadcast %cst_50 : f32 to vector<16x1xf32>
      %c0_51 = arith.constant 0 : index
      %c0_52 = arith.constant 0 : index
      %68 = vector.load %arg14[%c0_51, %c0_52] : memref<16x1xf32, #tpu.memory_space<vmem>>, vector<16x1xf32>
      tpu.vector_store %arg14[%c0_51, %c0_52], %67 {strides = array<i32>} : memref<16x1xf32, #tpu.memory_space<vmem>>, vector<16x1xf32>,
      %cst_53 = arith.constant 0.000000e+00 : f32
      %69 = vector.broadcast %cst_53 : f32 to vector<16x1xf32>
      %c0_54 = arith.constant 0 : index
      %c0_55 = arith.constant 0 : index
      %70 = vector.load %arg15[%c0_54, %c0_55] : memref<16x1xf32, #tpu.memory_space<vmem>>, vector<16x1xf32>
      tpu.vector_store %arg15[%c0_54, %c0_55], %69 {strides = array<i32>} : memref<16x1xf32, #tpu.memory_space<vmem>>, vector<16x1xf32>,
    } else {
    }
    %c0 = arith.constant 0 : index
    %c0_1 = arith.constant 0 : index
    %3 = vector.load %arg11[%c0, %c0_1] : memref<16x32xbf16, #tpu.memory_space<vmem>>, vector<16x32xbf16>
    %c0_2 = arith.constant 0 : index
    %c0_3 = arith.constant 0 : index
    %4 = vector.load %arg6[%c0_2, %c0_3] : memref<32x128xbf16, #tpu.memory_space<vmem>>, vector<32x128xbf16>
    %cst = arith.constant dense<0.000000e+00> : vector<16x128xf32>
    %5 = tpu.matmul %3, %4, %cst {dimension_numbers = #tpu.dot_dimension_numbers<[1], [0], [0], [1], [0, 0, 1, 1], [], []>} : vector<16x32xbf16>, vector<32x128xbf16>, vector<16x128xf32> -> vector<16x128xf32>
    %6 = tpu.iota {dimensions = array<i32: 1>} : vector<16x128xi32>
    %c128_i32 = arith.constant 128 : i32
    %7 = arith.muli %arg1, %c128_i32 : i32
    %8 = vector.broadcast %7 : i32 to vector<16x128xi32>
    %9 = arith.addi %6, %8 : vector<16x128xi32>
    %c0_4 = arith.constant 0 : index
    %c0_5 = arith.constant 0 : index
    %10 = vector.load %arg12[%c0_4, %c0_5] : memref<16x1xf32, #tpu.memory_space<vmem>>, vector<16x1xf32>
    %cst_6 = arith.constant dense<0xFF800000> : vector<16xf32>
    %11 = vector.multi_reduction <maximumf>, %5, %cst_6 [1] : vector<16x128xf32> to vector<16xf32>
    %12 = vector.shape_cast %11 : vector<16xf32> to vector<16x1xf32>
    %13 = arith.maximumf %10, %12 : vector<16x1xf32>
    %14 = arith.subf %10, %13 : vector<16x1xf32>
    %15 = math.exp %14 : vector<16x1xf32>
    %16 = vector.broadcast %13 : vector<16x1xf32> to vector<16x128xf32>
    %17 = arith.subf %5, %16 : vector<16x128xf32>
    %18 = math.exp %17 : vector<16x128xf32>
    %c0_7 = arith.constant 0 : index
    %c0_8 = arith.constant 0 : index
    %19 = vector.load %arg13[%c0_7, %c0_8] : memref<16x1xf32, #tpu.memory_space<vmem>>, vector<16x1xf32>
    %20 = arith.mulf %19, %15 : vector<16x1xf32>
    %cst_9 = arith.constant dense<0.000000e+00> : vector<16xf32>
    %21 = vector.multi_reduction <add>, %18, %cst_9 [1] : vector<16x128xf32> to vector<16xf32>
    %22 = vector.shape_cast %21 : vector<16xf32> to vector<16x1xf32>
    %23 = arith.addf %20, %22 : vector<16x1xf32>
    %c0_10 = arith.constant 0 : index
    %c0_11 = arith.constant 0 : index
    %24 = vector.load %arg13[%c0_10, %c0_11] : memref<16x1xf32, #tpu.memory_space<vmem>>, vector<16x1xf32>
    tpu.vector_store %arg13[%c0_10, %c0_11], %23 {strides = array<i32>} : memref<16x1xf32, #tpu.memory_space<vmem>>, vector<16x1xf32>,
    %c0_12 = arith.constant 0 : index
    %c0_13 = arith.constant 0 : index
    %25 = vector.load %arg14[%c0_12, %c0_13] : memref<16x1xf32, #tpu.memory_space<vmem>>, vector<16x1xf32>
    %26 = arith.mulf %25, %15 : vector<16x1xf32>
    %27 = arith.mulf %18, %5 : vector<16x128xf32>
    %cst_14 = arith.constant dense<0.000000e+00> : vector<16xf32>
    %28 = vector.multi_reduction <add>, %27, %cst_14 [1] : vector<16x128xf32> to vector<16xf32>
    %29 = vector.shape_cast %28 : vector<16xf32> to vector<16x1xf32>
    %30 = arith.addf %26, %29 : vector<16x1xf32>
    %c0_15 = arith.constant 0 : index
    %c0_16 = arith.constant 0 : index
    %31 = vector.load %arg14[%c0_15, %c0_16] : memref<16x1xf32, #tpu.memory_space<vmem>>, vector<16x1xf32>
    tpu.vector_store %arg14[%c0_15, %c0_16], %30 {strides = array<i32>} : memref<16x1xf32, #tpu.memory_space<vmem>>, vector<16x1xf32>,
    %c0_17 = arith.constant 0 : index
    %c0_18 = arith.constant 0 : index
    %32 = vector.load %arg12[%c0_17, %c0_18] : memref<16x1xf32, #tpu.memory_space<vmem>>, vector<16x1xf32>
    tpu.vector_store %arg12[%c0_17, %c0_18], %13 {strides = array<i32>} : memref<16x1xf32, #tpu.memory_space<vmem>>, vector<16x1xf32>,
    %c0_19 = arith.constant 0 : index
    %c0_20 = arith.constant 0 : index
    %33 = vector.load %arg2[%c0_19, %c0_20] : memref<16x1xi32, #tpu.memory_space<vmem>>, vector<16x1xi32>
    %34 = vector.broadcast %33 : vector<16x1xi32> to vector<16x128xi32>
    %35 = arith.cmpi eq, %9, %34 : vector<16x128xi32>
    %c0_21 = arith.constant 0 : index
    %c0_22 = arith.constant 0 : index
    %36 = vector.load %arg15[%c0_21, %c0_22] : memref<16x1xf32, #tpu.memory_space<vmem>>, vector<16x1xf32>
    %cst_23 = arith.constant 0.000000e+00 : f32
    %37 = vector.broadcast %cst_23 : f32 to vector<16x128xf32>
    %38 = arith.select %35, %5, %37 : vector<16x128xi1>, vector<16x128xf32>
    %cst_24 = arith.constant dense<0.000000e+00> : vector<16xf32>
    %39 = vector.multi_reduction <add>, %38, %cst_24 [1] : vector<16x128xf32> to vector<16xf32>
    %40 = vector.shape_cast %39 : vector<16xf32> to vector<16x1xf32>
    %41 = arith.addf %36, %40 : vector<16x1xf32>
    %c0_25 = arith.constant 0 : index
    %c0_26 = arith.constant 0 : index
    %42 = vector.load %arg15[%c0_25, %c0_26] : memref<16x1xf32, #tpu.memory_space<vmem>>, vector<16x1xf32>
    tpu.vector_store %arg15[%c0_25, %c0_26], %41 {strides = array<i32>} : memref<16x1xf32, #tpu.memory_space<vmem>>, vector<16x1xf32>,
    %c0_i32_27 = arith.constant 0 : i32
    %43 = arith.cmpi eq, %arg1, %c0_i32_27 : i32
    %44 = arith.extui %43 : i1 to i32
    %c0_i32_28 = arith.constant 0 : i32
    %45 = arith.cmpi ne, %44, %c0_i32_28 : i32
    scf.if %45 {
      %c0_29 = arith.constant 0 : index
      %c0_30 = arith.constant 0 : index
      %46 = vector.load %arg13[%c0_29, %c0_30] : memref<16x1xf32, #tpu.memory_space<vmem>>, vector<16x1xf32>
      %c0_31 = arith.constant 0 : index
      %c0_32 = arith.constant 0 : index
      %47 = vector.load %arg12[%c0_31, %c0_32] : memref<16x1xf32, #tpu.memory_space<vmem>>, vector<16x1xf32>
      %48 = math.log %46 : vector<16x1xf32>
      %49 = arith.addf %47, %48 : vector<16x1xf32>
      %c0_33 = arith.constant 0 : index
      %c0_34 = arith.constant 0 : index
      %50 = vector.load %arg15[%c0_33, %c0_34] : memref<16x1xf32, #tpu.memory_space<vmem>>, vector<16x1xf32>
      %51 = arith.subf %50, %49 : vector<16x1xf32>
      %c0_35 = arith.constant 0 : index
      %c0_36 = arith.constant 0 : index
      %52 = vector.load %arg8[%c0_35, %c0_36] : memref<16x1xf32, #tpu.memory_space<vmem>>, vector<16x1xf32>
      tpu.vector_store %arg8[%c0_35, %c0_36], %51 {strides = array<i32>} : memref<16x1xf32, #tpu.memory_space<vmem>>, vector<16x1xf32>,
      %c0_37 = arith.constant 0 : index
      %c0_38 = arith.constant 0 : index
      %53 = vector.load %arg14[%c0_37, %c0_38] : memref<16x1xf32, #tpu.memory_space<vmem>>, vector<16x1xf32>
      %54 = tpu.reciprocal %46 {approx = true} : vector<16x1xf32> -> vector<16x1xf32>
      %55 = arith.mulf %53, %54 : vector<16x1xf32>
      %56 = arith.subf %49, %55 : vector<16x1xf32>
      %c0_39 = arith.constant 0 : index
      %c0_40 = arith.constant 0 : index
      %57 = vector.load %arg9[%c0_39, %c0_40] : memref<16x1xf32, #tpu.memory_space<vmem>>, vector<16x1xf32>
      tpu.vector_store %arg9[%c0_39, %c0_40], %56 {strides = array<i32>} : memref<16x1xf32, #tpu.memory_space<vmem>>, vector<16x1xf32>,
    } else {
    }
    return
  }
  func.func @transform_0(%arg0: i32, %arg1: i32) -> (i32, i32) {
    %c0_i32 = arith.constant 0 : i32
    %c0_i32_0 = arith.constant 0 : i32
    return %arg0, %c0_i32 : i32, i32
  }
  func.func @transform_1(%arg0: i32, %arg1: i32) -> (i32, i32) {
    %c0_i32 = arith.constant 0 : i32
    %c0_i32_0 = arith.constant 0 : i32
    return %arg0, %c0_i32 : i32, i32
  }
  func.func @transform_2(%arg0: i32, %arg1: i32) -> (i32, i32) {
    %c0_i32 = arith.constant 0 : i32
    %c0_i32_0 = arith.constant 0 : i32
    %c0_i32_1 = arith.constant 0 : i32
    return %c0_i32, %c0_i32_0 : i32, i32
  }
  func.func @transform_3(%arg0: i32, %arg1: i32) -> (i32, i32) {
    %c0_i32 = arith.constant 0 : i32
    %c0_i32_0 = arith.constant 0 : i32
    %c0_i32_1 = arith.constant 0 : i32
    return %c0_i32, %c0_i32_0 : i32, i32
  }
  func.func @transform_4(%arg0: i32, %arg1: i32) -> (i32, i32) {
    %c0_i32 = arith.constant 0 : i32
    %c0_i32_0 = arith.constant 0 : i32
    return %c0_i32, %arg1 : i32, i32
  }
  func.func @transform_5(%arg0: i32, %arg1: i32) -> (i32, i32) {
    %c0_i32 = arith.constant 0 : i32
    %c0_i32_0 = arith.constant 0 : i32
    %c0_i32_1 = arith.constant 0 : i32
    return %c0_i32, %c0_i32_0 : i32, i32
  }
  func.func @transform_6(%arg0: i32, %arg1: i32) -> (i32, i32) {
    %c0_i32 = arith.constant 0 : i32
    %c0_i32_0 = arith.constant 0 : i32
    return %arg0, %c0_i32 : i32, i32
  }
  func.func @transform_7(%arg0: i32, %arg1: i32) -> (i32, i32) {
    %c0_i32 = arith.constant 0 : i32
    %c0_i32_0 = arith.constant 0 : i32
    return %arg0, %c0_i32 : i32, i32
  }
  func.func @transform_8(%arg0: i32, %arg1: i32) -> (i32, i32) {
    %c0_i32 = arith.constant 0 : i32
    %c0_i32_0 = arith.constant 0 : i32
    return %arg0, %c0_i32 : i32, i32
  }
}

</mosaic_0001>

<bundles_post_ra>
// kernel: tpu_custom_call.1
= control target key start
LH: loop header
LB: loop body
LE: loop exit
PB: predicated region body
PF: predicated region fallthrough
CT: control target
= control target key end

     0   :  { %14 = vsyncpa [#allocation8], 0  ;;  %s620_s0 = inlined_call_operand.vmem [shape: s32[16,1], index: 0, kind: input, shape index: {}]   ;;  %s621_s1 = inlined_call_operand.hbm [shape: bf16[16,32], index: 1, kind: input, shape index: {}]   ;;  %s622_s2 = inlined_call_operand.vmem [shape: bf16[32,32], index: 2, kind: input, shape index: {}]   ;;  %s623_s3 = inlined_call_operand.hbm [shape: f32[1,32], index: 3, kind: input, shape index: {}]   ;;  %s624_s4 = inlined_call_operand.vmem [shape: bf16[32,128], index: 4, kind: input, shape index: {}]   ;;  %s625_s5 = inlined_call_operand.vmem [shape: f32[1,32], index: 5, kind: input, shape index: {}]   ;;  %s626_s6 = inlined_call_operand.vmem [shape: f32[16,1], index: 6, kind: output, shape index: {0}]   ;;  %s627_s7 = inlined_call_operand.vmem [shape: f32[16,1], index: 7, kind: output, shape index: {1}]   ;;  %s628_s8 = inlined_call_operand.vmem [shape: f32[16,1], index: 8, kind: output, shape index: {2}]  }
   0x1   :  { %15 = vsyncpa [#allocation10], 0  ;;  %s469_s27 = smov [#allocation7]   ;;  %s421_s9 = scalar_lea.hbm %s621_s1, 128 }
   0x2   :  { %s23_s28 = sshll.u32 %s469_s27, 4  ;;  %p422_p0 = scmp.ne.s32.totalorder %s621_s1, %s421_s9  ;;  %s24_s28 = int_to_ptr.vmem [resolvable:$true] %s23_s28 }
   0x3   :  { %p425_p1 = scmp.lt.u32.totalorder %s421_s9, %s621_s1 }
   0x5   :  { %p427_p2 = pnand %p425_p1, %p422_p0 }
   0x7   :  { %430 = shalt.err (!%p427_p2)
}
   0x8   :  { %s431_s14 = scalar_lea.vmem %s24_s28, 128  ;;  %p436_p4 = scmp.lt.s32.totalorder %s24_s28, %s24_s28 }
   0x9   :  { %p432_p3 = scmp.ne.s32.totalorder %s24_s28, %s431_s14  ;;  %p437_p5 = scmp.lt.s32.totalorder %s431_s14, %s431_s14 }
   0xb   :  { %p438_p6 = por %p437_p5, %p436_p4 }
   0xd   :  { %p439_p7 = pnand %p438_p6, %p432_p3 }
   0xf   :  { %442 = shalt.err (!%p439_p7)
}
  0x10   :  { %s470_s15 = smov 64   ;;  %s471_s16 = smov 4  }
  0x11   :  { %29 = dma.hbm_to_vmem [thread:$0]  %s621_s1, 128, %s24_s28, [#allocation8], %s470_s15, %s470_s15, %s471_s16  }
  0x12   :  { %s472_s19 = smov [#allocation9]   ;;  %s443_s23 = scalar_lea.hbm %s623_s3, 16 }
  0x13   :  { %s38_s20 = sshll.u32 %s472_s19, 4  ;;  %p444_p8 = scmp.ne.s32.totalorder %s623_s3, %s443_s23  ;;  %s39_s20 = int_to_ptr.vmem [resolvable:$true] %s38_s20 }
  0x14   :  { %p447_p9 = scmp.lt.u32.totalorder %s443_s23, %s623_s3 }
  0x16   :  { %p449_p10 = pnand %p447_p9, %p444_p8 }
  0x18   :  { %452 = shalt.err (!%p449_p10)
}
  0x19   :  { %s453_s29 = scalar_lea.vmem %s39_s20, 16  ;;  %s457_s1 = scalar_lea.vmem %s39_s20, 32 }
  0x1a   :  { %p454_p11 = scmp.ne.s32.totalorder %s39_s20, %s453_s29  ;;  %p458_p12 = scmp.lt.s32.totalorder %s39_s20, %s39_s20 }
  0x1b   :  { %p459_p13 = scmp.lt.s32.totalorder %s457_s1, %s453_s29 }
  0x1d   :  { %p460_p0 = por %p459_p13, %p458_p12 }
  0x1f   :  { %p461_p1 = pnand %p460_p0, %p454_p11 }
  0x21   :  { %464 = shalt.err (!%p461_p1)
}
  0x22   :  { %41 = dma.hbm_to_vmem [thread:$0]  %s623_s3, 16, %s39_s20, [#allocation10]  }
  0x23   :  { %465 = dma.done.wait [#allocation8], 128  }
  0x24   :  { %466 = vsyncadd [#allocation8], 4294967168 }
  0x25   :  { %467 = dma.done.wait [#allocation10], 16  }
  0x26   :  { %468 = vsyncadd [#allocation10], 4294967280  ;;  %v473_v0 = vmov 0.0   ;;  %vm474_vm0 = vmmov 0   ;;  %v396_v1 = vld [vmem:[%s622_s2] sm:$0xff]   ;;  %v397_v2 = vld [vmem:[%s622_s2 + $0x8] sm:$0xff]   ;;  %v226_v41 = vlaneseq }
  0x27   :  { %370 = vmatprep.subr.bf16.mxu0 %v473_v0  ;;  %374 = vmatprep.mubr.msk.bf16.mxu0 %vm474_vm0, %v473_v0  ;;  %v398_v3 = vld [vmem:[#allocation7] sm:$0xff]   ;;  %vm87_vm1 = vcmask 261120   ;;  %v399_v4 = vld [vmem:[%s624_s4] sm:$0xff]   ;;  %v355_v6 = vld [vmem:[#allocation9] ss:$0 sm:$0xff]  ;;  %v475_v19 = vmov 0  }
  0x28   :  { %378 = vmatprep.subr.bf16.mxu1 %v473_v0  ;;  %382 = vmatprep.mubr.msk.bf16.mxu1 %vm474_vm0, %v473_v0  ;;  %v400_v5 = vld [vmem:[%s624_s4 + $0x8] sm:$0xff]   ;;  %vm149_vm2 = vcmask 7168   ;;  %v476_v20 = vmov -1e+30   ;;  %v290_v25 = vld [vmem:[%s620_s0] sm:$0xff]  ;;  %v227_v43 = vand.u32 127, %v226_v41 }
  0x29   :  { %371 = vmatpush3.bf16.msra.mxu0 %v396_v1  ;;  %379 = vmatpush3.bf16.msra.mxu1 %v399_v4  ;;  %156 = vst.msk [vmem:[#allocation3] sm:$0xff] %vm149_vm2, %v476_v20  ;;  %157 = vst.msk [vmem:[#allocation3 + $0x8] sm:$0xff] %vm149_vm2, %v476_v20  ;;  %v291_v34 = vld [vmem:[%s620_s0 + $0x8] sm:$0xff]  ;;  %v360_v50 = vld [vmem:[%s625_s5] ss:$0 sm:$0xff] }
  0x2a   :  { %372 = vmatprep.subr.bf16.mxu0 %v473_v0  ;;  %380 = vmatprep.subr.bf16.mxu1 %v473_v0  ;;  %158 = vst.msk [vmem:[#allocation4] sm:$0xff] %vm149_vm2, %v473_v0  ;;  %159 = vst.msk [vmem:[#allocation4 + $0x8] sm:$0xff] %vm149_vm2, %v473_v0 }
  0x2b   :  { %395 = vset.pattern.permute.xlu0 %v475_v19  ;;  %394 = vset.pattern.permute.xlu1 %v475_v19  ;;  %160 = vst.msk [vmem:[#allocation5] sm:$0xff] %vm149_vm2, %v473_v0  ;;  %161 = vst.msk [vmem:[#allocation5 + $0x8] sm:$0xff] %vm149_vm2, %v473_v0 }
  0x2c   :  { %162 = vst.msk [vmem:[#allocation6] sm:$0xff] %vm149_vm2, %v473_v0  ;;  %163 = vst.msk [vmem:[#allocation6 + $0x8] sm:$0xff] %vm149_vm2, %v473_v0 }
  0x2d   :  { %373 = vmatpush3.bf16.msra.mxu0 %v397_v2  ;;  %381 = vmatpush3.bf16.msra.mxu1 %v400_v5 }
  0x30   :  { %375 = vmatmul.mubr.msk.bf16.vlgmr.msra.gmra.mrb[0].mxu0 %vm87_vm1, %v398_v3  ;;  %v231_v26 = vld [vmem:[#allocation3] sm:$0xff]  ;;  %v232_v29 = vld [vmem:[#allocation3 + $0x8] sm:$0xff] }
  0x31   :  { %v261_v59 = vld [vmem:[#allocation4] sm:$0xff]  ;;  %v262_v0 = vld [vmem:[#allocation4 + $0x8] sm:$0xff] }
  0x32   :  { %v274_v60 = vld [vmem:[#allocation5] sm:$0xff] }
 0x103   :  { %v125_v7 = vpop.f32.mrb[0].mxu0 }
 0x104   :  { %v126_v8 = vadd.f32 %v355_v6, %v125_v7  ;;  %v376_v9 = vpop.f32.mrb[1].mxu0 }
 0x105   :  { %v128_v10 = vpop.f32.mrb[2].mxu0 }
 0x106   :  { %401 = vtanh.f32 %v126_v8  ;;  %v129_v11 = vadd.f32 %v355_v6, %v128_v10  ;;  %v377_v12 = vpop.f32.mrb[3].mxu0  ;;  %v300_v8 = vld [vmem:[#allocation6] sm:$0xff]  ;;  %v275_v10 = vld [vmem:[#allocation5 + $0x8] sm:$0xff] }
 0x108   :  { %403 = vtanh.f32 %v129_v11 }
 0x110   :  { %v559_v13 = vpop.eup %401 }
 0x111   :  { %v152_v15 = vmul.f32 1.4285715, %v559_v13  ;;  %v141_v52 = vmul.f32 %v559_v13, %v360_v50 }
 0x112   :  { %v561_v14 = vpop.eup %403 }
 0x113   :  { %v153_v16 = vmul.f32 1.4285715, %v561_v14  ;;  %v143_v53 = vsel %vm87_vm1, %v141_v52, 0.0  ;;  %v142_v54 = vmul.f32 %v561_v14, %v360_v50 }
 0x115   :  { %v154_v17 = vpack.c.bf16 %v153_v16, %v152_v15  ;;  %v146_v55 = vsel %vm87_vm1, %v142_v54, 0.0 }
 0x117   :  { %155 = vst.msk [vmem:[#allocation2] sm:$0xff] %vm87_vm1, %v154_v17  ;;  %v301_v17 = vld [vmem:[#allocation6 + $0x8] sm:$0xff] }
 0x11e   :  { %v164_v18 = vld [vmem:[#allocation2] sm:$0xff] }
 0x11f   :  { %383 = vmatmul.mubr.msk.bf16.vlgmr.msra.gmra.mrb[0].mxu1 %vm87_vm1, %v164_v18 }
 0x1f2   :  { %v219_v21 = vpop.f32.mrb[0].mxu1 }
 0x1f3   :  { %233 = vmax.xlane.f32.xlu0 %v219_v21  ;;  %v384_v22 = vpop.f32.mrb[1].mxu1 }
 0x1f4   :  { %v222_v23 = vpop.f32.mrb[2].mxu1 }
 0x1f5   :  { %v385_v24 = vpop.f32.mrb[3].mxu1 }
 0x1f7   :  { %235 = vmax.xlane.f32.xlu0 %v222_v23 }
 0x20d   :  { %293 = vperm.xlu0 %395, %v290_v25  }
 0x280   :  { %v234_v27 = vpop.xlane.xlu0 %233 }
 0x281   :  { %v237_v28 = vmax.f32 %v231_v26, %v234_v27 }
 0x283   :  { %v239_v30 = vsub.f32 %v231_v26, %v237_v28  ;;  %288 = vst.msk [vmem:[#allocation3] sm:$0xff] %vm149_vm2, %v237_v28  ;;  %247 = vperm.xlu1 %394, %v237_v28  }
 0x284   :  { %v236_v31 = vpop.xlane.xlu0 %235 }
 0x285   :  { %v238_v32 = vmax.f32 %v232_v29, %v236_v31  ;;  %v241_v56 = vmul.f32 1.442695, %v239_v30 }
 0x287   :  { %v240_v33 = vsub.f32 %v232_v29, %v238_v32  ;;  %289 = vst.msk [vmem:[#allocation3 + $0x8] sm:$0xff] %vm149_vm2, %v238_v32  ;;  %252 = vperm.xlu1 %394, %v238_v32  }
 0x289   :  { %v243_v57 = vmul.f32 1.442695, %v240_v33 }
 0x28a   :  { %v317_v24 = vld [vmem:[#allocation3] sm:$0xff] }
 0x28b   :  { %296 = vperm.xlu1 %394, %v291_v34  }
 0x28c   :  { %v294_v45 = vpop.permute.xlu0 %293 }
 0x28d   :  { %vm298_vm3 = vcmp.eq.s32.totalorder %v227_v43, %v294_v45 }
 0x28e   :  { %v302_v47 = vsel %vm298_vm3, %v219_v21, 0.0 }
 0x302   :  { %v248_v35 = vpop.permute.xlu1 %247 }
 0x303   :  { %v255_v36 = vsub.f32 %v219_v21, %v248_v35  ;;  %v318_v35 = vld [vmem:[#allocation3 + $0x8] sm:$0xff] }
 0x305   :  { %v257_v37 = vmul.f32 1.442695, %v255_v36 }
 0x306   :  { %v253_v38 = vpop.permute.xlu1 %252 }
 0x307   :  { %405 = vpow2.f32 %v257_v37  ;;  %v256_v39 = vsub.f32 %v222_v23, %v253_v38 }
 0x309   :  { %v259_v40 = vmul.f32 1.442695, %v256_v39 }
 0x30a   :  { %v297_v48 = vpop.permute.xlu1 %296 }
 0x30b   :  { %407 = vpow2.f32 %v259_v40  ;;  %vm299_vm4 = vcmp.eq.s32.totalorder %v227_v43, %v297_v48 }
 0x30c   :  { %v303_v51 = vsel %vm299_vm4, %v222_v23, 0.0  ;;  %409 = vpow2.f32 %v241_v56 }
 0x30d   :  { %411 = vpow2.f32 %v243_v57 }
 0x311   :  { %v406_v42 = vpop.eup %405 }
 0x312   :  { %265 = vadd.xlane.f32.xlu1 %v406_v42  ;;  %v278_v44 = vmul.f32 %v406_v42, %v219_v21 }
 0x314   :  { %280 = vadd.xlane.f32.xlu0 %v278_v44 }
 0x315   :  { %v408_v46 = vpop.eup %407 }
 0x316   :  { %267 = vadd.xlane.f32.xlu1 %v408_v46  ;;  %v279_v49 = vmul.f32 %v408_v46, %v222_v23  ;;  %v410_v58 = vpop.eup %409 }
 0x317   :  { %v263_v61 = vmul.f32 %v410_v58, %v261_v59  ;;  %v412_v62 = vpop.eup %411  ;;  %v276_v2 = vmul.f32 %v410_v58, %v274_v60 }
 0x318   :  { %v264_v5 = vmul.f32 %v412_v62, %v262_v0  ;;  %v277_v13 = vmul.f32 %v412_v62, %v275_v10 }
 0x31a   :  { %304 = vadd.xlane.f32.xlu1 %v302_v47 }
 0x31e   :  { %282 = vadd.xlane.f32.xlu1 %v279_v49 }
 0x322   :  { %306 = vadd.xlane.f32.xlu1 %v303_v51 }
 0x326   :  { %144 = vadd.xlane.f32.xlu1 %v143_v53 }
 0x32a   :  { %147 = vadd.xlane.f32.xlu1 %v146_v55 }
 0x39f   :  { %v266_v63 = vpop.xlane.xlu1 %265 }
 0x3a0   :  { %v269_v1 = vadd.f32 %v266_v63, %v263_v61 }
 0x3a1   :  { %v281_v3 = vpop.xlane.xlu0 %280 }
 0x3a2   :  { %272 = vst.msk [vmem:[#allocation4] sm:$0xff] %vm149_vm2, %v269_v1  ;;  %v284_v4 = vadd.f32 %v281_v3, %v276_v2 }
 0x3a3   :  { %v268_v6 = vpop.xlane.xlu1 %267 }
 0x3a4   :  { %286 = vst.msk [vmem:[#allocation5] sm:$0xff] %vm149_vm2, %v284_v4  ;;  %v270_v7 = vadd.f32 %v268_v6, %v264_v5 }
 0x3a6   :  { %273 = vst.msk [vmem:[#allocation4 + $0x8] sm:$0xff] %vm149_vm2, %v270_v7 }
 0x3a7   :  { %v305_v9 = vpop.xlane.xlu1 %304 }
 0x3a8   :  { %v308_v11 = vadd.f32 %v305_v9, %v300_v8 }
 0x3a9   :  { %v315_v12 = vld [vmem:[#allocation4] sm:$0xff] }
 0x3aa   :  { %413 = vlog2.f32 %v315_v12  ;;  %310 = vst.msk [vmem:[#allocation6] sm:$0xff] %vm149_vm2, %v308_v11 }
 0x3ab   :  { %415 = vrcp.f32 %v315_v12  ;;  %v283_v14 = vpop.xlane.xlu1 %282  ;;  %v331_v25 = vld [vmem:[#allocation5] sm:$0xff] }
 0x3ac   :  { %v285_v15 = vadd.f32 %v283_v14, %v277_v13 }
 0x3ad   :  { %v316_v16 = vld [vmem:[#allocation4 + $0x8] sm:$0xff] }
 0x3ae   :  { %417 = vlog2.f32 %v316_v16  ;;  %287 = vst.msk [vmem:[#allocation5 + $0x8] sm:$0xff] %vm149_vm2, %v285_v15 }
 0x3af   :  { %419 = vrcp.f32 %v316_v16  ;;  %v307_v18 = vpop.xlane.xlu1 %306 }
 0x3b0   :  { %v309_v19 = vadd.f32 %v307_v18, %v301_v17 }
 0x3b1   :  { %v325_v30 = vld [vmem:[#allocation6] sm:$0xff] }
 0x3b2   :  { %311 = vst.msk [vmem:[#allocation6 + $0x8] sm:$0xff] %vm149_vm2, %v309_v19 }
 0x3b3   :  { %v145_v20 = vpop.xlane.xlu1 %144 }
 0x3b4   :  { %v414_v21 = vpop.eup %413  ;;  %150 = vst.msk [vmem:[%s628_s8] sm:$0xff] %vm149_vm2, %v145_v20 }
 0x3b5   :  { %v416_v22 = vpop.eup %415  ;;  %v320_v23 = vmul.f32 0.6931472, %v414_v21  ;;  %v332_v36 = vld [vmem:[#allocation5 + $0x8] sm:$0xff] }
 0x3b6   :  { %v335_v26 = vmul.f32 %v416_v22, %v331_v25 }
 0x3b7   :  { %v323_v27 = vadd.f32 %v320_v23, %v317_v24  ;;  %v148_v28 = vpop.xlane.xlu1 %147 }
 0x3b8   :  { %v418_v29 = vpop.eup %417  ;;  %151 = vst.msk [vmem:[%s628_s8 + $0x8] sm:$0xff] %vm149_vm2, %v148_v28 }
 0x3b9   :  { %v420_v31 = vpop.eup %419  ;;  %v327_v32 = vsub.f32 %v325_v30, %v323_v27  ;;  %v337_v33 = vsub.f32 %v323_v27, %v335_v26  ;;  %v322_v34 = vmul.f32 0.6931472, %v418_v29  ;;  %v326_v39 = vld [vmem:[#allocation6 + $0x8] sm:$0xff] }
 0x3ba   :  { %v336_v37 = vmul.f32 %v420_v31, %v332_v36 }
 0x3bb   :  { %329 = vst.msk [vmem:[%s626_s6] sm:$0xff] %vm149_vm2, %v327_v32  ;;  %339 = vst.msk [vmem:[%s627_s7] sm:$0xff] %vm149_vm2, %v337_v33  ;;  %v324_v38 = vadd.f32 %v322_v34, %v318_v35 }
 0x3bd   :  { %v338_v40 = vsub.f32 %v324_v38, %v336_v37  ;;  %v328_v41 = vsub.f32 %v326_v39, %v324_v38 }
 0x3bf   :  { %340 = vst.msk [vmem:[%s627_s7 + $0x8] sm:$0xff] %vm149_vm2, %v338_v40  ;;  %330 = vst.msk [vmem:[%s626_s6 + $0x8] sm:$0xff] %vm149_vm2, %v328_v41 }
 0x3c0   :  { %353 = vsyncpa [#allocation8], 1 }
 0x3c1   :  { %354 = vsyncpa [#allocation10], 1 }

</bundles_post_ra>
